<compile_context>
chip_gen: v6e
topology: v6e:2x2x1
jax: 0.10.0
libtpu: 0.0.40
codegen_flags: <defaults>
</compile_context>

<pallas_src>
import jax
import jax.numpy as jnp
from jax.experimental import pallas as pl
from jax.experimental.pallas import tpu as pltpu


def _h_swish_kernel(x_ref, o_ref):
    x = x_ref[...]
    # h_sigmoid(x) = ReLU6(x + 3) / 6 ; h_swish(x) = x * h_sigmoid(x)
    # Python-float constants are weak-typed, so bf16 inputs stay bf16.
    hs = jnp.clip(x + 3.0, 0.0, 6.0) * (1.0 / 6.0)
    o_ref[...] = x * hs


def h_swish(x, *, lanes=512, block_rows=1024):
    """Elementwise h_swish on any-shaped tensor (NCHW in the module) via Pallas.

    The tensor is flattened into a lane-dense (rows, lanes) slab, padded so
    every block is full-width, processed with a 1-D pipelined grid, and
    reshaped back.
    """
    orig_shape = x.shape
    dtype = x.dtype
    total = int(x.size)

    flat = x.reshape(-1)

    rows = pl.cdiv(total, lanes)
    if rows <= block_rows:
        # Small input: one block covering the full (rows, lanes) slab.
        block_rows = rows
        grid_rows = 1
    else:
        # Large input: fixed full-size tiles; round rows up so every block is
        # full (keeps unmasked full-width stores on the hot path).
        grid_rows = pl.cdiv(rows, block_rows)
        rows = grid_rows * block_rows

    padded_total = rows * lanes
    if padded_total != total:
        flat = jnp.pad(flat, (0, padded_total - total))
    x2d = flat.reshape(rows, lanes)

    out2d = pl.pallas_call(
        _h_swish_kernel,
        out_shape=jax.ShapeDtypeStruct((rows, lanes), dtype),
        grid_spec=pltpu.PrefetchScalarGridSpec(
            num_scalar_prefetch=0,
            grid=(grid_rows,),
            in_specs=[pl.BlockSpec((block_rows, lanes), lambda i: (i, 0))],
            out_specs=pl.BlockSpec((block_rows, lanes), lambda i: (i, 0)),
        ),
        compiler_params=pltpu.CompilerParams(
            dimension_semantics=("parallel",),
        ),
    )(x2d)

    out_flat = out2d.reshape(-1)
    if padded_total != total:
        out_flat = out_flat[:total]
    return out_flat.reshape(orig_shape)


def _h_swish_ref(x):
    return x * (jnp.clip(x + 3.0, 0.0, 6.0) / 6.0)


if __name__ == "__main__":
    key = jax.random.PRNGKey(0)

    # Primary check: NCHW input matching the PyTorch module's conv-style use.
    x = jax.random.normal(key, (2, 4, 16, 16), dtype=jnp.float32) * 4.0
    out = jax.block_until_ready(h_swish(x))
    ref = _h_swish_ref(x)
    assert out.shape == x.shape and out.dtype == x.dtype
    assert jnp.allclose(out, ref, atol=1e-6, rtol=1e-6)

    # Secondary checks (cheap) to exercise the padded tail and the multi-block
    # tiled path with small shapes.
    x_odd = jax.random.normal(jax.random.PRNGKey(0), (2, 3, 7, 5),
                              dtype=jnp.float32) * 4.0
    out_odd = jax.block_until_ready(h_swish(x_odd))
    assert jnp.allclose(out_odd, _h_swish_ref(x_odd), atol=1e-6, rtol=1e-6)

    out_tiled = jax.block_until_ready(h_swish(x, lanes=128, block_rows=8))
    assert jnp.allclose(out_tiled, ref, atol=1e-6, rtol=1e-6)

    print("KERNEL_OK")
</pallas_src>

<mosaic_0001>
module attributes {stable_mosaic.version = 11 : i64} {
  func.func @_h_swish_kernel(%arg0: i32, %arg1: memref<4x512xf32, #tpu.memory_space<vmem>>, %arg2: memref<4x512xf32, #tpu.memory_space<vmem>>) attributes {dimension_semantics = [#tpu.dimension_semantics<parallel>], iteration_bounds = array<i64: 1>, scalar_prefetch = 0 : i64, scratch_operands = 0 : i64, tpu.core_type = #tpu.core_type<tc>, window_params = [{transform_indices = @transform_0, window_bounds = array<i64: 4, 512>}, {transform_indices = @transform_1, window_bounds = array<i64: 4, 512>}]} {
    %c0 = arith.constant 0 : index
    %c0_0 = arith.constant 0 : index
    %0 = vector.load %arg1[%c0, %c0_0] : memref<4x512xf32, #tpu.memory_space<vmem>>, vector<4x512xf32>
    %cst = arith.constant 3.000000e+00 : f32
    %1 = vector.broadcast %cst : f32 to vector<4x512xf32>
    %2 = arith.addf %0, %1 : vector<4x512xf32>
    %cst_1 = arith.constant 0.000000e+00 : f32
    %cst_2 = arith.constant 6.000000e+00 : f32
    %3 = vector.broadcast %cst_1 : f32 to vector<4x512xf32>
    %4 = arith.maximumf %3, %2 : vector<4x512xf32>
    %5 = vector.broadcast %cst_2 : f32 to vector<4x512xf32>
    %6 = arith.minimumf %5, %4 : vector<4x512xf32>
    %cst_3 = arith.constant 0.166666672 : f32
    %7 = vector.broadcast %cst_3 : f32 to vector<4x512xf32>
    %8 = arith.mulf %6, %7 : vector<4x512xf32>
    %9 = arith.mulf %0, %8 : vector<4x512xf32>
    %c0_4 = arith.constant 0 : index
    %c0_5 = arith.constant 0 : index
    %10 = vector.load %arg2[%c0_4, %c0_5] : memref<4x512xf32, #tpu.memory_space<vmem>>, vector<4x512xf32>
    tpu.vector_store %arg2[%c0_4, %c0_5], %9 {strides = array<i32>} : memref<4x512xf32, #tpu.memory_space<vmem>>, vector<4x512xf32>,
    return
  }
  func.func @transform_0(%arg0: i32) -> (i32, i32) {
    %c0_i32 = arith.constant 0 : i32
    %c0_i32_0 = arith.constant 0 : i32
    return %arg0, %c0_i32 : i32, i32
  }
  func.func @transform_1(%arg0: i32) -> (i32, i32) {
    %c0_i32 = arith.constant 0 : i32
    %c0_i32_0 = arith.constant 0 : i32
    return %arg0, %c0_i32 : i32, i32
  }
}

</mosaic_0001>

<bundles_post_ra>
// kernel: tpu_custom_call.1
= control target key start
LH: loop header
LB: loop body
LE: loop exit
PB: predicated region body
PF: predicated region fallthrough
CT: control target
= control target key end

     0   :  { %6 = vsyncpa [#allocation3], 0  ;;  %s114_s0 = inlined_call_operand.hbm [shape: f32[4,512], index: 0, kind: input, shape index: {}]   ;;  %s115_s1 = inlined_call_operand.hbm [shape: f32[4,512], index: 1, kind: output, shape index: {}]  }
   0x1   :  { %7 = vsyncpa [#allocation4], 0  ;;  %s96_s6 = smov [#allocation2]  }
   0x2   :  { %s14_s7 = sshll.u32 %s96_s6, 4  ;;  %s15_s7 = int_to_ptr.vmem [resolvable:$true] %s14_s7 }
   0x3   :  { %s60_s8 = scalar_lea.vmem %s15_s7, 256  ;;  %p65_p1 = scmp.lt.s32.totalorder %s15_s7, %s15_s7 }
   0x4   :  { %p61_p0 = scmp.ne.s32.totalorder %s15_s7, %s60_s8  ;;  %p66_p2 = scmp.lt.s32.totalorder %s60_s8, %s60_s8 }
   0x6   :  { %p67_p3 = por %p66_p2, %p65_p1 }
   0x8   :  { %p68_p4 = pnand %p67_p3, %p61_p0 }
   0xa   :  { %71 = shalt.err (!%p68_p4)
}
   0xb   :  { %17 = dma.hbm_to_vmem [thread:$0]  %s114_s0, 256, %s15_s7, [#allocation3]  }
   0xc   :  { %92 = dma.done.wait [#allocation3], 256  }
   0xd   :  { %93 = vsyncadd [#allocation3], 4294967040  ;;  %v21_v0 = vld [vmem:[#allocation2] sm:$0xff]  ;;  %v22_v1 = vld [vmem:[#allocation2 + $0x8] sm:$0xff]  ;;  %s97_s11 = smov [#allocation5]  }
   0xe   :  { %v23_v2 = vadd.f32 3.0, %v21_v0  ;;  %v24_v3 = vadd.f32 3.0, %v22_v1  ;;  %s41_s12 = sshll.u32 %s97_s11, 4  ;;  %s42_s12 = int_to_ptr.vmem [resolvable:$true] %s41_s12 }
   0xf   :  { %s72_s0 = scalar_lea.vmem %s42_s12, 256  ;;  %p77_p6 = scmp.lt.s32.totalorder %s42_s12, %s42_s12 }
  0x10   :  { %v25_v4 = vmax.f32 %v23_v2, 0.0  ;;  %v26_v5 = vmax.f32 %v24_v3, 0.0  ;;  %p73_p5 = scmp.ne.s32.totalorder %s42_s12, %s72_s0  ;;  %p78_p7 = scmp.lt.s32.totalorder %s72_s0, %s72_s0 }
  0x12   :  { %v27_v6 = vmin.f32 %v25_v4, 6.0  ;;  %v28_v7 = vmin.f32 %v26_v5, 6.0  ;;  %p79_p8 = por %p78_p7, %p77_p6 }
  0x14   :  { %v29_v8 = vmul.f32 0.16666667, %v27_v6  ;;  %v30_v9 = vmul.f32 0.16666667, %v28_v7  ;;  %p80_p9 = pnand %p79_p8, %p73_p5 }
  0x16   :  { %v31_v10 = vmul.f32 %v29_v8, %v21_v0  ;;  %v32_v11 = vmul.f32 %v30_v9, %v22_v1 }
  0x18   :  { %33 = vst [vmem:[#allocation5] sm:$0xff] %v31_v10  ;;  %34 = vst [vmem:[#allocation5 + $0x8] sm:$0xff] %v32_v11 }
  0x19   :  { %83 = shalt.err (!%p80_p9)
}
  0x1a   :  { %44 = dma.vmem_to_hbm [thread:$0]  %s42_s12, 256, %s115_s1, [#allocation4]  }
  0x1b   :  { %94 = dma.done.wait [#allocation4], 256  }
  0x1c   :  { %95 = vsyncadd [#allocation4], 4294967040 }
  0x1d   :  { %48 = vsyncpa [#allocation3], 1 }
  0x1e   :  { %49 = vsyncpa [#allocation4], 1 }

</bundles_post_ra>
